<compile_context>
chip_gen: v7x
topology: tpu7x:2x2x1
jax: 0.10.0
libtpu: 0.0.40
codegen_flags: <defaults>
</compile_context>

<pallas_src>
import functools

import jax
import jax.numpy as jnp
from jax.experimental import pallas as pl
from jax.experimental.pallas import tpu as pltpu


def gab_kernel(x_ref, w1t_ref, b1_ref, w2t_ref, b2_ref, o_ref, *, inv_hw):
    # x_ref: (NB, C, HW) block in the caller's dtype (bf16/f32).
    x = x_ref[...]

    # Global average pool over the spatial (lane) axis, accumulated in fp32.
    # Mosaic masks the lane tail correctly when HW is not a multiple of 128,
    # so the sum is exact; inv_hw is a trace-time constant.
    pooled = jnp.sum(x.astype(jnp.float32), axis=-1) * inv_hw        # (NB, C)

    # Excitation MLP as batched matmuls (one MXU push per block).
    h = jnp.dot(pooled, w1t_ref[...],
                preferred_element_type=jnp.float32) + b1_ref[...]    # (NB, C_r)
    h = jnp.maximum(h, 0.0)
    z = jnp.dot(h, w2t_ref[...],
                preferred_element_type=jnp.float32) + b2_ref[...]    # (NB, C)
    z = jax.nn.sigmoid(z)                                            # fp32

    # Gate the input in the I/O dtype (broadcast over the lane/spatial axis).
    gate = z.astype(x.dtype)[:, :, None]                             # (NB, C, 1)
    o_ref[...] = (x * gate).astype(o_ref.dtype)


def gab_forward(x_nchw, w1, b1, w2, b2, *, block_bytes_target=4 << 20):
    """x_nchw: (N, C, H, W), any float dtype (bf16 recommended for bandwidth).
    w1: (C_r, C), b1: (C_r,), w2: (C, C_r), b2: (C,).
    Returns (N, C, H, W) in the same dtype as x_nchw."""
    N, C, H, W = x_nchw.shape
    HW = H * W
    C_r = w1.shape[0]
    dtype = x_nchw.dtype
    itemsize = jnp.dtype(dtype).itemsize

    # Flatten spatial dims: free metadata reshape, no copy, no padding.
    x = x_nchw.reshape(N, C, HW)

    # --- per-batch-element VMEM footprint (lane / sublane padded) ------------
    lane_pad = pl.cdiv(HW, 128) * 128
    sub_mult = 8 * max(1, 4 // itemsize)            # f32: 8, bf16: 16 sublanes
    c_pad = pl.cdiv(C, sub_mult) * sub_mult
    per_elem_vmem = c_pad * lane_pad * itemsize

    # --- NB = largest divisor of N whose block fits the target size ----------
    cap = max(1, int(block_bytes_target) // int(per_elem_vmem))
    cap = min(cap, N)
    if N >= 2:
        cap = min(cap, N // 2)                      # keep >= 2 grid steps (v7x)
    cap = max(int(cap), 1)
    NB = 1
    for d in range(1, cap + 1):
        if N % d == 0:
            NB = d
    grid = (N // NB,)

    # --- small fp32 parameters, laid out for batched (NB,C)@(C,C_r) matmuls --
    w1t = jnp.asarray(w1, jnp.float32).T            # (C, C_r)
    w2t = jnp.asarray(w2, jnp.float32).T            # (C_r, C)
    b1r = jnp.asarray(b1, jnp.float32).reshape(1, C_r)
    b2r = jnp.asarray(b2, jnp.float32).reshape(1, C)

    # --- explicit VMEM budget: double-buffered input + output + params/slack -
    block_vmem = NB * per_elem_vmem
    vmem_limit = int(min(64 << 20, max(24 << 20, 4 * block_vmem + (2 << 20))))

    # Advisory cost estimate for the XLA scheduler: the op is mem-bound.
    bytes_accessed = 2 * N * C * HW * itemsize + 2 * C * C_r * 4 + (C + C_r) * 4
    cost = pl.CostEstimate(
        flops=2 * N * C * HW + 4 * N * C * C_r,
        transcendentals=N * C,
        bytes_accessed=bytes_accessed,
    )

    kernel = functools.partial(gab_kernel, inv_hw=1.0 / float(HW))

    out = pl.pallas_call(
        kernel,
        out_shape=jax.ShapeDtypeStruct((N, C, HW), dtype),
        grid_spec=pltpu.PrefetchScalarGridSpec(
            num_scalar_prefetch=0,
            grid=grid,
            in_specs=[
                # Last two block dims equal the full array dims (C, HW), so no
                # (8,128) divisibility requirement and no wrapper padding.
                pl.BlockSpec((NB, C, HW), lambda n: (n, 0, 0)),     # x
                pl.BlockSpec((C, C_r), lambda n: (0, 0)),           # w1^T
                pl.BlockSpec((1, C_r), lambda n: (0, 0)),           # b1
                pl.BlockSpec((C_r, C), lambda n: (0, 0)),           # w2^T
                pl.BlockSpec((1, C), lambda n: (0, 0)),             # b2
            ],
            out_specs=pl.BlockSpec((NB, C, HW), lambda n: (n, 0, 0)),
        ),
        compiler_params=pltpu.CompilerParams(
            dimension_semantics=("parallel",),
            vmem_limit_bytes=vmem_limit,
        ),
        cost_estimate=cost,
    )(x, w1t, b1r, w2t, b2r)

    return out.reshape(N, C, H, W)


def gab_reference(x, w1, b1, w2, b2):
    # Pure-JAX fp32 reference for sanity checking.
    xf = x.astype(jnp.float32)
    z = jnp.mean(xf, axis=(2, 3), keepdims=True)                     # (N,C,1,1)
    z = jnp.einsum('rc,nchw->nrhw', w1, z) + b1[None, :, None, None]
    z = jnp.maximum(z, 0.0)
    z = jnp.einsum('cr,nrhw->nchw', w2, z) + b2[None, :, None, None]
    z = jax.nn.sigmoid(z)
    return xf * z


if __name__ == "__main__":
    key = jax.random.PRNGKey(0)
    k_x, k_w1, k_b1, k_w2, k_b2, k_x2, k_x3 = jax.random.split(key, 7)

    reduction = 4

    # ---- Test 1: bf16 I/O, 128-aligned spatial (input_dim=16) ---------------
    N, C, H, W = 2, 16, 16, 16
    C_r = C // reduction
    x_f32 = jax.random.normal(k_x, (N, C, H, W), dtype=jnp.float32)
    w1 = jax.random.normal(k_w1, (C_r, C), dtype=jnp.float32) * 0.1
    b1 = jax.random.normal(k_b1, (C_r,), dtype=jnp.float32) * 0.1
    w2 = jax.random.normal(k_w2, (C, C_r), dtype=jnp.float32) * 0.1
    b2 = jax.random.normal(k_b2, (C,), dtype=jnp.float32) * 0.1

    x_bf16 = x_f32.astype(jnp.bfloat16)
    out_bf16 = jax.block_until_ready(gab_forward(x_bf16, w1, b1, w2, b2))
    assert out_bf16.shape == (N, C, H, W)
    assert out_bf16.dtype == jnp.bfloat16
    ref_bf16 = gab_reference(x_bf16, w1, b1, w2, b2)
    assert jnp.allclose(out_bf16.astype(jnp.float32), ref_bf16,
                        atol=2e-2, rtol=2e-2)

    # ---- Test 2: fp32 I/O, non-128-multiple spatial (7x7) + odd batch -------
    N2, C2, H2, W2 = 3, 8, 7, 7
    C2_r = C2 // reduction
    x2 = jax.random.normal(k_x2, (N2, C2, H2, W2), dtype=jnp.float32)
    w1b = jax.random.normal(k_w1, (C2_r, C2), dtype=jnp.float32) * 0.1
    b1b = jax.random.normal(k_b1, (C2_r,), dtype=jnp.float32) * 0.1
    w2b = jax.random.normal(k_w2, (C2, C2_r), dtype=jnp.float32) * 0.1
    b2b = jax.random.normal(k_b2, (C2,), dtype=jnp.float32) * 0.1

    out2 = jax.block_until_ready(gab_forward(x2, w1b, b1b, w2b, b2b))
    ref2 = gab_reference(x2, w1b, b1b, w2b, b2b)
    assert out2.shape == (N2, C2, H2, W2)
    assert out2.dtype == jnp.float32
    assert jnp.allclose(out2, ref2, atol=1e-5, rtol=1e-5)

    # ---- Test 3: bf16 I/O, NB>1 batching path (N=4, 12x12 spatial) ----------
    N3, C3, H3, W3 = 4, 16, 12, 12
    C3_r = C3 // reduction
    x3 = jax.random.normal(k_x3, (N3, C3, H3, W3),
                           dtype=jnp.float32).astype(jnp.bfloat16)
    out3 = jax.block_until_ready(gab_forward(x3, w1, b1, w2, b2))
    ref3 = gab_reference(x3, w1, b1, w2, b2)
    assert out3.shape == (N3, C3, H3, W3)
    assert out3.dtype == jnp.bfloat16
    assert jnp.allclose(out3.astype(jnp.float32), ref3, atol=2e-2, rtol=2e-2)

    print("KERNEL_OK")
</pallas_src>

<mosaic_0001>
module attributes {stable_mosaic.version = 11 : i64} {
  func.func @gab_kernel(%arg0: i32, %arg1: memref<1x16x256xbf16, #tpu.memory_space<vmem>>, %arg2: memref<16x4xf32, #tpu.memory_space<vmem>>, %arg3: memref<1x4xf32, #tpu.memory_space<vmem>>, %arg4: memref<4x16xf32, #tpu.memory_space<vmem>>, %arg5: memref<1x16xf32, #tpu.memory_space<vmem>>, %arg6: memref<1x16x256xbf16, #tpu.memory_space<vmem>>) attributes {dimension_semantics = [#tpu.dimension_semantics<parallel>], iteration_bounds = array<i64: 2>, scalar_prefetch = 0 : i64, scratch_operands = 0 : i64, tpu.core_type = #tpu.core_type<tc>, window_params = [{transform_indices = @transform_0, window_bounds = array<i64: 1, 16, 256>}, {pipeline_mode = #tpu.pipeline_mode<synchronous>, transform_indices = @transform_1, window_bounds = array<i64: 16, 4>}, {pipeline_mode = #tpu.pipeline_mode<synchronous>, transform_indices = @transform_2, window_bounds = array<i64: 1, 4>}, {pipeline_mode = #tpu.pipeline_mode<synchronous>, transform_indices = @transform_3, window_bounds = array<i64: 4, 16>}, {pipeline_mode = #tpu.pipeline_mode<synchronous>, transform_indices = @transform_4, window_bounds = array<i64: 1, 16>}, {transform_indices = @transform_5, window_bounds = array<i64: 1, 16, 256>}]} {
    %c0 = arith.constant 0 : index
    %c0_0 = arith.constant 0 : index
    %c0_1 = arith.constant 0 : index
    %0 = vector.load %arg1[%c0, %c0_0, %c0_1] : memref<1x16x256xbf16, #tpu.memory_space<vmem>>, vector<1x16x256xbf16>
    %1 = arith.extf %0 : vector<1x16x256xbf16> to vector<1x16x256xf32>
    %cst = arith.constant dense<0.000000e+00> : vector<1x16xf32>
    %2 = vector.multi_reduction <add>, %1, %cst [2] : vector<1x16x256xf32> to vector<1x16xf32>
    %cst_2 = arith.constant 3.906250e-03 : f32
    %3 = vector.broadcast %cst_2 : f32 to vector<1x16xf32>
    %4 = arith.mulf %2, %3 : vector<1x16xf32>
    %c0_3 = arith.constant 0 : index
    %c0_4 = arith.constant 0 : index
    %5 = vector.load %arg2[%c0_3, %c0_4] : memref<16x4xf32, #tpu.memory_space<vmem>>, vector<16x4xf32>
    %cst_5 = arith.constant dense<0.000000e+00> : vector<1x4xf32>
    %6 = tpu.matmul %4, %5, %cst_5 {dimension_numbers = #tpu.dot_dimension_numbers<[1], [0], [0], [1], [0, 0, 1, 1], [], []>} : vector<1x16xf32>, vector<16x4xf32>, vector<1x4xf32> -> vector<1x4xf32>
    %c0_6 = arith.constant 0 : index
    %c0_7 = arith.constant 0 : index
    %7 = vector.load %arg3[%c0_6, %c0_7] : memref<1x4xf32, #tpu.memory_space<vmem>>, vector<1x4xf32>
    %8 = arith.addf %6, %7 : vector<1x4xf32>
    %cst_8 = arith.constant 0.000000e+00 : f32
    %9 = vector.broadcast %cst_8 : f32 to vector<1x4xf32>
    %10 = arith.maximumf %8, %9 : vector<1x4xf32>
    %c0_9 = arith.constant 0 : index
    %c0_10 = arith.constant 0 : index
    %11 = vector.load %arg4[%c0_9, %c0_10] : memref<4x16xf32, #tpu.memory_space<vmem>>, vector<4x16xf32>
    %cst_11 = arith.constant dense<0.000000e+00> : vector<1x16xf32>
    %12 = tpu.matmul %10, %11, %cst_11 {dimension_numbers = #tpu.dot_dimension_numbers<[1], [0], [0], [1], [0, 0, 1, 1], [], []>} : vector<1x4xf32>, vector<4x16xf32>, vector<1x16xf32> -> vector<1x16xf32>
    %c0_12 = arith.constant 0 : index
    %c0_13 = arith.constant 0 : index
    %13 = vector.load %arg5[%c0_12, %c0_13] : memref<1x16xf32, #tpu.memory_space<vmem>>, vector<1x16xf32>
    %14 = arith.addf %12, %13 : vector<1x16xf32>
    %15 = arith.negf %14 : vector<1x16xf32>
    %16 = math.exp %15 : vector<1x16xf32>
    %cst_14 = arith.constant 1.000000e+00 : f32
    %17 = vector.broadcast %cst_14 : f32 to vector<1x16xf32>
    %18 = arith.addf %17, %16 : vector<1x16xf32>
    %19 = arith.divf %17, %18 : vector<1x16xf32>
    %20 = arith.truncf %19 : vector<1x16xf32> to vector<1x16xbf16>
    %21 = vector.shape_cast %20 : vector<1x16xbf16> to vector<1x16x1xbf16>
    %22 = vector.broadcast %21 : vector<1x16x1xbf16> to vector<1x16x256xbf16>
    %23 = arith.mulf %0, %22 : vector<1x16x256xbf16>
    %c0_15 = arith.constant 0 : index
    %c0_16 = arith.constant 0 : index
    %c0_17 = arith.constant 0 : index
    %24 = vector.load %arg6[%c0_15, %c0_16, %c0_17] : memref<1x16x256xbf16, #tpu.memory_space<vmem>>, vector<1x16x256xbf16>
    tpu.vector_store %arg6[%c0_15, %c0_16, %c0_17], %23 {strides = array<i32>} : memref<1x16x256xbf16, #tpu.memory_space<vmem>>, vector<1x16x256xbf16>,
    return
  }
  func.func @transform_0(%arg0: i32) -> (i32, i32, i32) {
    %c0_i32 = arith.constant 0 : i32
    %c0_i32_0 = arith.constant 0 : i32
    %c0_i32_1 = arith.constant 0 : i32
    return %arg0, %c0_i32, %c0_i32_0 : i32, i32, i32
  }
  func.func @transform_1(%arg0: i32) -> (i32, i32) {
    %c0_i32 = arith.constant 0 : i32
    %c0_i32_0 = arith.constant 0 : i32
    %c0_i32_1 = arith.constant 0 : i32
    return %c0_i32, %c0_i32_0 : i32, i32
  }
  func.func @transform_2(%arg0: i32) -> (i32, i32) {
    %c0_i32 = arith.constant 0 : i32
    %c0_i32_0 = arith.constant 0 : i32
    %c0_i32_1 = arith.constant 0 : i32
    return %c0_i32, %c0_i32_0 : i32, i32
  }
  func.func @transform_3(%arg0: i32) -> (i32, i32) {
    %c0_i32 = arith.constant 0 : i32
    %c0_i32_0 = arith.constant 0 : i32
    %c0_i32_1 = arith.constant 0 : i32
    return %c0_i32, %c0_i32_0 : i32, i32
  }
  func.func @transform_4(%arg0: i32) -> (i32, i32) {
    %c0_i32 = arith.constant 0 : i32
    %c0_i32_0 = arith.constant 0 : i32
    %c0_i32_1 = arith.constant 0 : i32
    return %c0_i32, %c0_i32_0 : i32, i32
  }
  func.func @transform_5(%arg0: i32) -> (i32, i32, i32) {
    %c0_i32 = arith.constant 0 : i32
    %c0_i32_0 = arith.constant 0 : i32
    %c0_i32_1 = arith.constant 0 : i32
    return %arg0, %c0_i32, %c0_i32_0 : i32, i32, i32
  }
}

</mosaic_0001>

<bundles_post_ra>
// kernel: tpu_custom_call.1
= control target key start
LH: loop header
LB: loop body
LE: loop exit
PB: predicated region body
PF: predicated region fallthrough
CT: control target
= control target key end

     0   :  { %10 = vsyncpa [#allocation3], 0  ;;  %s983_s0 = inlined_call_operand.hbm [shape: bf16[2,16,256], index: 0, kind: input, shape index: {}]   ;;  %s984_s1 = inlined_call_operand.vmem [shape: f32[16,4], index: 1, kind: input, shape index: {}]   ;;  %s985_s2 = inlined_call_operand.vmem [shape: f32[1,4], index: 2, kind: input, shape index: {}]   ;;  %s986_s3 = inlined_call_operand.vmem [shape: f32[4,16], index: 3, kind: input, shape index: {}]   ;;  %s987_s4 = inlined_call_operand.vmem [shape: f32[1,16], index: 4, kind: input, shape index: {}]   ;;  %s988_s5 = inlined_call_operand.hbm [shape: bf16[2,16,256], index: 5, kind: output, shape index: {}]  }
   0x1   :  { %12 = vsyncpa [#allocation3 + $0x1], 0 }
   0x2   :  { %13 = vsyncpa [#allocation4], 0 }
   0x3   :  { %15 = vsyncpa [#allocation4 + $0x1], 0  ;;  %s792_s18 = smov 0   ;;  %s794_s19 = smov 0  }
   0x4   :  { %s796_s20 = smov 0   ;;  %s798_s21 = smov 0  }
   0x5 LB: > { %s813_s22 = sadd.s32 4294967295, %s749_s21   ;;  %s554_s23 = sadd.s32 4294967294, %s749_s21   ;;  %s749_s21 = sphi %s798_s21, %s1001_s21   ;;  %s745_s20 = sphi %s796_s20, %s1000_s20   ;;  %s741_s19 = sphi %s794_s19, %s999_s19   ;;  %s737_s18 = sphi %s792_s18, %s998_s18  }
   0x6   : > { %s817_s24 = sadd.s32 1, %s749_s21   ;;  %s28_s25 = sadd.s32 1, %s745_s20 }
   0x7   : > { %s25_s26 = ssub.s32 %s749_s21, %s817_s24  ;;  %p35_p0 = scmp.ne.s32.totalorder %s745_s20, %s741_s19 }
   0x8   : > { %p26_p1 = scmp.eq.s32.totalorder %s25_s26, 0  ;;  %p36_p2 = scmp.eq.s32.totalorder %s749_s21, 0 }
   0x9   : > { %p41_p3 = scmp.ne.s32.totalorder %s741_s19, %s737_s18  ;;  %p42_p4 = scmp.eq.s32.totalorder %s813_s22, 0 }
   0xa   : > { %s829_s27 = scalar_select %p26_p1, %s745_s20, %s28_s25  }
   0xb   : > { %p831_p5 = por %p36_p2, %p35_p0  ;;  %p835_p6 = por %p42_p4, %p41_p3 }
   0xc   : > { %p149_p7 = scmp.eq.s32.totalorder %s813_s22, 1  ;;  %p155_p8 = scmp.eq.s32.totalorder %s554_s23, 1 }
   0xd   : > { %p606_p10 = scmp.lt.s32.totalorder %s749_s21, 2  ;;  %s187_s7 = sand.u32 1, %s745_s20  }
   0xe   : > { %p842_p11 = por %p149_p7, %p35_p0  ;;  %p846_p12 = por %p155_p8, %p41_p3 }
   0xf   : > { %s572_s8 = sshll.u32 %s749_s21, 8  ;;  %s557_s9 = sshll.u32 %s187_s7, 4 }
  0x10   : > { %s992_s30 = scalar_select %p842_p11, 1, 0 }
  0x11   : > { %s993_s6 = scalar_select %p846_p12, 1, 0 }
  0x12   : > { %s855_s12 = scalar_lea.hbm %s983_s0, %s572_s8  ;;  %s191_s13 = scalar_lea.vmem [#allocation2], %s557_s9 }
  0x13   : > { %s198_s14 = sshll.u32 %s191_s13, 4  ;;  %p859_p13 = pnand %p606_p10, %p831_p5  ;;  %s863_s14 = int_to_ptr.vmem [resolvable:$true] %s198_s14 }
  0x14   : > { %s865_s16 = scalar_lea.sflag [#allocation3], %s187_s7  ;;  %s653_s17 = scalar_lea.hbm %s855_s12, 256 }
  0x15   : > { %p654_p0 = scmp.ne.s32.totalorder %s855_s12, %s653_s17  ;;  %p655_p1 = pneg %p859_p13 }
  0x16   : > { %s658_s26 = scalar_lea.hbm %s983_s0, 512  ;;  %p659_p4 = scmp.lt.u32.totalorder %s855_s12, %s983_s0 }
  0x17   : > { %p656_p2 = pnand %p655_p1, %p654_p0  ;;  %p660_p5 = scmp.lt.u32.totalorder %s658_s26, %s653_s17 }
  0x18   : > { %p662_p8 = scmp.lt.u32.totalorder %s653_s17, %s855_s12 }
  0x19   : > { %p657_p3 = pneg %p656_p2  ;;  %p661_p7 = por %p660_p5, %p659_p4 }
  0x1b   : > { %p663_p10 = por %p662_p8, %p661_p7 }
  0x1d   : > { %p664_p9 = pnand %p663_p10, %p657_p3 }
  0x1f   : > { %667 = shalt.err (!%p664_p9)
}
  0x20   : > { %s668_s7 = scalar_lea.vmem %s863_s14, 256  ;;  %s751_s9 = smov [#allocation2]  }
  0x21   : > { %p669_p0 = scmp.ne.s32.totalorder %s863_s14, %s668_s7  ;;  %s673_s10 = sshll.u32 %s751_s9, 4  ;;  %s674_s10 = int_to_ptr.vmem [resolvable:$false] %s673_s10 }
  0x22   : > { %s675_s11 = scalar_lea.vmem %s674_s10, 512  ;;  %p676_p11 = scmp.lt.s32.totalorder %s863_s14, %s674_s10 }
  0x23   : > { %p671_p2 = pnand %p669_p0, %p655_p1  ;;  %p677_p4 = scmp.lt.s32.totalorder %s675_s11, %s668_s7 }
  0x25   : > { %p672_p12 = pneg %p671_p2  ;;  %p678_p5 = por %p677_p4, %p676_p11 }
  0x27   : > { %p679_p7 = pnand %p678_p5, %p672_p12 }
  0x29   : > { %682 = shalt.err (!%p679_p7)
}
  0x2a   : > { %s752_s13 = smov 128   ;;  %s753_s17 = smov 8  }
  0x2b   : > { %601 = dma.hbm_to_vmem [thread:$0]  (!%p859_p13), %s855_s12, 256, %s863_s14, %s865_s16, %s752_s13, %s752_s13, %s753_s17  }
  0x2c   : > { %p560_p9 = scmp.ge.s32.totalorder %s749_s21, 1  ;;  %p206_p1 = scmp.lt.s32.totalorder %s749_s21, 3 }
  0x2e   : > { %p207_p3 = pnand %p560_p9, %p206_p1 }
  0x2f   : > { %s896_s23 = sand.u32 (!%p207_p3), 1, %s741_s19  }
  0x30   : > { %210 = sbr.rel (%p207_p3) target bundleno = 808 (0x328), region = 40  ;;  %s561_s25 = sshll.u32 (!%p207_p3), %s896_s23, 4 }
  0x31   : > { %s213_s26 = scalar_lea.sflag (!%p207_p3), [#allocation3], %s896_s23  ;;  %s216_s28 = scalar_lea.vmem (!%p207_p3), [#allocation2], %s561_s25 }
  0x37   : > { %728 = dma.done.wait (%p835_p6), %s213_s26, 256  }
  0x38   : > { %730 = vsyncadd (%p835_p6), %s213_s26, 4294967040  ;;  %v906_v0 = vld [vmem:[%s216_s28] sm:$0xff]  ;;  %v908_v1 = vld [vmem:[%s216_s28 + $0x8] sm:$0xff]  ;;  %v754_v11 = vmov 0.0|0.0   ;;  %vm755_vm0 = vmmov 0   ;;  %v756_v12 = vmov 0.0   ;;  %v262_v13 = vlaneseq }
  0x39   : > { %v245_v2 = vunpack.c.l.bf16 %v906_v0  ;;  %v246_v3 = vunpack.c.h.bf16 %v906_v0  ;;  %v247_v4 = vunpack.c.l.bf16 %v908_v1  ;;  %v248_v5 = vunpack.c.h.bf16 %v908_v1  ;;  %v257_v8 = vld [vmem:[%s984_s1] sm:$0xff]  ;;  %v258_v9 = vld [vmem:[%s984_s1 + $0x8] sm:$0xff]  ;;  %591 = vmatprep.subr.bf16.mxu0 %v754_v11  ;;  %583 = vmatprep.mubr.msk.f32.mxu0 %vm755_vm0, %v756_v12  ;;  %s242_s13 = scalar_lea.vmem [#allocation5], %s561_s25  ;;  %s573_s26 = sshll.u32 %s813_s22, 8 }
  0x3a   : > { %v592_v10 = vpack.c.bf16 %v258_v9, %v257_v8  ;;  %586 = vmatprep.subr.mxu1 %v756_v12  ;;  %588 = vmatprep.mubr.msk.f32.mxu1 %vm755_vm0, %v756_v12  ;;  %v263_v14 = vand.u32 127, %v262_v13  ;;  %v265_v15 = vshrl.u32 %v262_v13, 7  ;;  %vm273_vm1 = vcmask 130112   ;;  %v349_v26 = vld [vmem:[%s986_s3] sm:$0xf]  ;;  %s481_s17 = sshll.u32 %s242_s13, 4  ;;  %s937_s14 = scalar_lea.hbm %s988_s5, %s573_s26  ;;  %s932_s17 = int_to_ptr.vmem [resolvable:$true] %s481_s17 }
  0x3b   : > { %v249_v6 = vadd.f32 %v246_v3, %v245_v2  ;;  %v252_v7 = vadd.f32 %v248_v5, %v247_v4  ;;  %vm275_vm2 = vcmask 130048   ;;  %vm355_vm3 = vcmask 1043456   ;;  %v259_v27 = vld [vmem:[%s985_s2] sm:$0x1]  ;;  %s468_s22 = scalar_lea.sflag [#allocation4], %s896_s23  ;;  %s683_s25 = scalar_lea.vmem %s932_s17, 256 }
  0x3c   : > { %593 = vmatpush3.bf16.msra.mxu0 %v592_v10  ;;  %v268_v16 = vadd.s32 4294967288, %v263_v14  ;;  %v266_v18 = vsub.s32 %v263_v14, %v265_v15  ;;  %587 = vmatpush3.msk.msra.mxu1 %vm355_vm3, %v349_v26  ;;  %vm351_vm4 = vcmask 31744   ;;  %v350_v32 = vld [vmem:[%s987_s4] sm:$0x1]  ;;  %v441_v41 = vsub.s32 0, %v265_v15  ;;  %p684_p6 = scmp.ne.s32.totalorder %s932_s17, %s683_s25  ;;  %p995_p11 = scmp.ne.s32.totalorder %s992_s30, 0 }
  0x3d   : > { %250 = vadd.xlane.f32.xlu0 %v249_v6  ;;  %v757_v44 = vmov 839922192   ;;  %v758_v46 = vmov 1985246804   ;;  %s759_s29 = smov [#allocation5]  }
  0x3e   : > { %v271_v20 = vsub.s32 %v268_v16, %v265_v15  ;;  %v448_v45 = vunpack.c.l.s4 %v757_v44  ;;  %v455_v47 = vunpack.c.l.s4 %v758_v46  ;;  %p685_p12 = pnand %p684_p6, %p995_p11  ;;  %s687_s15 = sshll.u32 %s759_s29, 4  ;;  %s688_s15 = int_to_ptr.vmem [resolvable:$false] %s687_s15 }
  0x3f   : > { %s689_s16 = scalar_lea.vmem %s688_s15, 512  ;;  %p690_p8 = scmp.lt.s32.totalorder %s932_s17, %s688_s15 }
  0x40   : > { %v449_v48 = vunpack.c.0.s8 %v448_v45  ;;  %v456_v49 = vunpack.c.0.s8 %v455_v47  ;;  %p686_p13 = pneg %p685_p12  ;;  %p691_p10 = scmp.lt.s32.totalorder %s689_s16, %s683_s25 }
  0x41   : > { %253 = vadd.xlane.f32.xlu0 %v252_v7 }
  0x42   : > { %v452_v50 = vsub.s32 %v449_v48, %v265_v15  ;;  %v459_v51 = vsub.s32 %v456_v49, %v265_v15  ;;  %p692_p0 = por %p691_p10, %p690_p8 }
  0x44   : > { %p693_p2 = pnand %p692_p0, %p686_p13 }
  0xca   : > { %v251_v17 = vpop.xlane.xlu0 %250 }
  0xcb   : > { %v255_v19 = vmul.f32 0.00390625, %v251_v17 }
  0xcd   : > { %v267_v23 = vrot.slane %v255_v19, %v266_v18 }
  0xce   : > { %v254_v21 = vpop.xlane.xlu0 %253 }
  0xcf   : > { %v256_v22 = vmul.f32 0.00390625, %v254_v21 }
  0xd1   : > { %v272_v24 = vrot.slane %v256_v22, %v271_v20 }
  0xd3   : > { %v274_v25 = vsel %vm273_vm1, %v272_v24, %v267_v23 }
  0xd4   : > { %584 = vmatmul.mubr.msk.f32.vlgmr.msra.gmra.mrb[0].mxu0 %vm275_vm2, %v274_v25 }
 0x1a7   : > { %v344_v28 = vpop.f32.mrb[0].mxu0 }
 0x1a8   : > { %v345_v29 = vadd.f32 %v344_v28, %v259_v27  ;;  %v585_v30 = vpop.f32.mrb[1].mxu0 }
 0x1aa   : > { %v348_v31 = vmax.f32 %v345_v29, 0.0 }
 0x1ac   : > { %589 = vmatmul.mubr.msk.f32.vlgmr.msra.gmra.mrb[0].mxu1 %vm351_vm4, %v348_v31 }
 0x27f   : > { %v425_v33 = vpop.f32.mrb[0].mxu1 }
 0x280   : > { %v426_v34 = vadd.f32 %v425_v33, %v350_v32  ;;  %v590_v35 = vpop.f32.mrb[1].mxu1 }
 0x282   : > { %v566_v36 = vmul.f32 -1.442695, %v426_v34 }
 0x284   : > { %649 = vpow2.f32 %v566_v36 }
 0x28e   : > { %v650_v37 = vpop.eup %649 }
 0x28f   : > { %v432_v38 = vadd.f32 1.0, %v650_v37 }
 0x291   : > { %651 = vrcp.f32 %v432_v38 }
 0x29b   : > { %v652_v39 = vpop.eup %651 }
 0x29c   : > { %v435_v40 = vpack.c.bf16 %v652_v39, %v652_v39 }
 0x29e   : > { %v437_v42 = vpack.i.b16 %v435_v40, %v435_v40 }
 0x2a0   : > { %v442_v43 = vrot.slane %v437_v42, %v441_v41 }
 0x2a2   : > { %444 = vbcast.lane.c.b16.xlu1 %v442_v43, 256 }
 0x314   : > { %v445_v52 = vpop.permute.xlu1 %444 }
 0x315   : > { %v453_v53 = vrot.slane %v445_v52, %v452_v50  ;;  %v460_v54 = vrot.slane %v445_v52, %v459_v51 }
 0x317   : > { %v463_v55 = vmul.bf16 %v453_v53, %v906_v0  ;;  %v464_v56 = vmul.bf16 %v460_v54, %v908_v1 }
 0x319   : > { %465 = vst [vmem:[%s242_s13] sm:$0xff] %v463_v55  ;;  %466 = vst [vmem:[%s242_s13 + $0x8] sm:$0xff] %v464_v56 }
 0x31a   : > { %696 = shalt.err (!%p693_p2)
}
 0x31b   : > { %s697_s8 = scalar_lea.hbm %s937_s14, 256  ;;  %s701_s10 = scalar_lea.hbm %s988_s5, 512 }
 0x31c   : > { %p698_p4 = scmp.ne.s32.totalorder %s937_s14, %s697_s8  ;;  %p702_p9 = scmp.lt.u32.totalorder %s937_s14, %s988_s5 }
 0x31d   : > { %p703_p1 = scmp.lt.u32.totalorder %s701_s10, %s697_s8  ;;  %p705_p6 = scmp.lt.u32.totalorder %s697_s8, %s937_s14 }
 0x31e   : > { %p699_p5 = pnand %p698_p4, %p995_p11 }
 0x31f   : > { %p704_p3 = por %p703_p1, %p702_p9 }
 0x320   : > { %p700_p7 = pneg %p699_p5 }
 0x321   : > { %p706_p12 = por %p705_p6, %p704_p3 }
 0x323   : > { %p707_p13 = pnand %p706_p12, %p700_p7 }
 0x325   : > { %710 = shalt.err (!%p707_p13)
}
 0x326   : > { %s760_s26 = smov 128   ;;  %s761_s28 = smov 8  }
 0x327   : > { %596 = dma.vmem_to_hbm [thread:$0]  (%p995_p11), %s932_s17, 256, %s937_s14, %s468_s22, %s760_s26, %s760_s26, %s761_s28  }
 0x328 PF: > { %s496_s12 = sand.u32 1, %s737_s18   ;;  %p996_p8 = scmp.ne.s32.totalorder %s993_s6, 0 }
 0x329   : > { %p997_p10 = scmp.ge.s32.totalorder %s749_s21, 2  ;;  %s497_s25 = scalar_lea.sflag [#allocation4], %s496_s12 }
 0x32b   : > { %p603_p0 = pnand %p997_p10, %p996_p8 }
 0x32d   : > { %732 = dma.done.wait (!%p603_p0), %s497_s25, 256  }
 0x32e   : > { %734 = vsyncadd (!%p603_p0), %s497_s25, 4294967040  ;;  %p18_p2 = scmp.ge.s32.totalorder %s817_s24, 4   ;;  %s998_s18 = smov %s741_s19 }
 0x32f   : > { %s999_s19 = smov %s745_s20  ;;  %s1000_s20 = smov %s829_s27 }
 0x330   : > { %s1001_s21 = smov %s817_s24  ;;  %20 = sbr.rel (!%p18_p2) target bundleno = 5 (0x5), region = 85 }
 0x337   :  { %502 = vsyncpa [#allocation3], 1 }
 0x338   :  { %504 = vsyncpa [#allocation3 + $0x1], 1 }
 0x339   :  { %505 = vsyncpa [#allocation4], 1 }
 0x33a   :  { %507 = vsyncpa [#allocation4 + $0x1], 1 }

</bundles_post_ra>
